<compile_context>
chip_gen: v7x
topology: tpu7x:2x2x1
jax: 0.10.0
libtpu: 0.0.40
codegen_flags: <defaults>
</compile_context>

<pallas_src>
import functools

import jax
import jax.numpy as jnp
from jax.experimental import pallas as pl
from jax.experimental.pallas import tpu as pltpu


def _bert_output_kernel(x_ref, w_ref, b_ref, res_ref, gamma_ref, beta_ref,
                        o_ref, *, eps, inv_h):
    # x_ref:     (tm, I)   hidden_states tile (intermediate width)
    # w_ref:     (I,  H)   dense weight, pre-transposed so y = x @ w
    # b_ref:     (1,  H)   dense bias
    # res_ref:   (tm, H)   residual input_tensor tile
    # gamma_ref: (1,  H)   LayerNorm weight
    # beta_ref:  (1,  H)   LayerNorm bias

    # Dense: native-dtype operands on the MXU, f32 accumulation.
    y = jnp.dot(x_ref[...], w_ref[...], preferred_element_type=jnp.float32)
    y = y + b_ref[...].astype(jnp.float32)

    # Dropout is identity at inference (eval mode).
    # TODO(synk): training-mode dropout (pltpu.prng_* + mask) not implemented.

    # Residual add (f32).
    z = y + res_ref[...].astype(jnp.float32)

    # LayerNorm over the hidden axis in f32; hoisted 1/H constant.
    mean = jnp.sum(z, axis=-1, keepdims=True) * inv_h
    centered = z - mean
    var = jnp.sum(centered * centered, axis=-1, keepdims=True) * inv_h
    norm = centered * jax.lax.rsqrt(var + eps)
    out = (norm * gamma_ref[...].astype(jnp.float32)
           + beta_ref[...].astype(jnp.float32))

    o_ref[...] = out.astype(o_ref.dtype)


def prepare_dense_weight(dense_weight):
    """Transpose the PyTorch (out_features, in_features) weight to (in, out).

    Do this ONCE at parameter-load time, not per forward call."""
    return jnp.asarray(dense_weight).T


def bert_output(hidden_states, input_tensor, dense_weight_t, dense_bias,
                ln_weight, ln_bias, *, eps=1e-12, row_tile=256):
    """hidden_states: (B, S, I); input_tensor: (B, S, H);
    dense_weight_t: (I, H) — already transposed via prepare_dense_weight."""
    B, S, I = hidden_states.shape
    H = input_tensor.shape[-1]
    assert dense_weight_t.shape == (I, H)
    rows = B * S
    out_dtype = hidden_states.dtype

    # Row tile: target 256 (v6e/v7x MXU width, multiple of 128 for v5e).
    # For small inputs shrink to the rounded-up row count (multiple of 8).
    tile = min(int(row_tile), max(8, ((rows + 7) // 8) * 8))
    padded_rows = pl.cdiv(rows, tile) * tile

    x2d = hidden_states.reshape(rows, I)
    r2d = input_tensor.reshape(rows, H)
    if padded_rows != rows:
        pad = padded_rows - rows
        x2d = jnp.pad(x2d, ((0, pad), (0, 0)))
        r2d = jnp.pad(r2d, ((0, pad), (0, 0)))

    b2d = dense_bias.reshape(1, H)
    g2d = ln_weight.reshape(1, H)
    be2d = ln_bias.reshape(1, H)

    grid = (padded_rows // tile,)

    # --- VMEM budget: resident weight/params + double-buffered row tiles. ---
    def nbytes(shape, dt):
        n = 1
        for d in shape:
            n *= d
        return n * jnp.dtype(dt).itemsize

    resident = (nbytes((I, H), dense_weight_t.dtype)
                + 3 * nbytes((1, H), dense_bias.dtype))
    tiles = 2 * (nbytes((tile, I), x2d.dtype)
                 + nbytes((tile, H), r2d.dtype)
                 + nbytes((tile, H), out_dtype))
    scratch = 4 * nbytes((tile, H), jnp.float32)  # f32 LN intermediates headroom
    vmem_limit = int(min(max(resident + tiles + scratch + (4 << 20), 32 << 20),
                         56 << 20))  # stay under v7x's 64 MiB physical VMEM

    cost = pl.CostEstimate(
        flops=2 * padded_rows * I * H + 10 * padded_rows * H,
        transcendentals=padded_rows,  # one rsqrt per row
        bytes_accessed=(nbytes((padded_rows, I), x2d.dtype)
                        + nbytes((padded_rows, H), r2d.dtype)
                        + nbytes((padded_rows, H), out_dtype)
                        + resident),
    )

    out2d = pl.pallas_call(
        functools.partial(_bert_output_kernel, eps=float(eps), inv_h=1.0 / H),
        out_shape=jax.ShapeDtypeStruct((padded_rows, H), out_dtype),
        grid_spec=pltpu.PrefetchScalarGridSpec(
            num_scalar_prefetch=0,
            grid=grid,
            in_specs=[
                pl.BlockSpec((tile, I), lambda i: (i, 0)),  # x tile
                pl.BlockSpec((I, H), lambda i: (0, 0)),     # weight (resident)
                pl.BlockSpec((1, H), lambda i: (0, 0)),     # bias
                pl.BlockSpec((tile, H), lambda i: (i, 0)),  # residual tile
                pl.BlockSpec((1, H), lambda i: (0, 0)),     # ln gamma
                pl.BlockSpec((1, H), lambda i: (0, 0)),     # ln beta
            ],
            out_specs=pl.BlockSpec((tile, H), lambda i: (i, 0)),
        ),
        compiler_params=pltpu.CompilerParams(
            dimension_semantics=("parallel",),
            vmem_limit_bytes=vmem_limit,
        ),
        cost_estimate=cost,
    )(x2d, dense_weight_t, b2d, r2d, g2d, be2d)

    return out2d[:rows].reshape(B, S, H)


def _reference(hidden_states, input_tensor, dense_weight, dense_bias,
               ln_weight, ln_bias, eps):
    # dense_weight in PyTorch convention: (out_features, in_features) = (H, I)
    y = jnp.einsum("bsi,hi->bsh", hidden_states, dense_weight) + dense_bias
    z = y + input_tensor
    mean = jnp.mean(z, axis=-1, keepdims=True)
    var = jnp.mean((z - mean) ** 2, axis=-1, keepdims=True)
    return (z - mean) * jax.lax.rsqrt(var + eps) * ln_weight + ln_bias


if __name__ == "__main__":
    # Small config consistent with BertOutput: intermediate_size=64, hidden=32.
    B, S, I, H = 2, 8, 64, 32
    eps = 1e-12

    key = jax.random.PRNGKey(0)
    k1, k2, k3, k4 = jax.random.split(key, 4)

    hidden_states = jax.random.normal(k1, (B, S, I), dtype=jnp.float32)
    input_tensor = jax.random.normal(k2, (B, S, H), dtype=jnp.float32)

    # Parameters (ILSLinear ~ Linear(I, H), ILSLayerNorm ~ LayerNorm(H)).
    dense_weight = jax.random.normal(k3, (H, I), dtype=jnp.float32) * 0.02  # (out, in)
    dense_bias = jax.random.normal(k4, (H,), dtype=jnp.float32) * 0.02
    ln_weight = jnp.ones((H,), dtype=jnp.float32)
    ln_bias = jnp.zeros((H,), dtype=jnp.float32)

    # One-time weight prep (hoisted transpose), then the fused kernel call.
    dense_weight_t = prepare_dense_weight(dense_weight)
    out = bert_output(hidden_states, input_tensor, dense_weight_t, dense_bias,
                      ln_weight, ln_bias, eps=eps)
    out = jax.block_until_ready(out)

    ref = _reference(hidden_states, input_tensor, dense_weight, dense_bias,
                     ln_weight, ln_bias, eps)
    assert out.shape == (B, S, H)
    assert jnp.allclose(out, ref, atol=1e-5, rtol=1e-4), "mismatch vs reference"

    print("KERNEL_OK")
</pallas_src>

<mosaic_0001>
module attributes {stable_mosaic.version = 11 : i64} {
  func.func @_bert_output_kernel(%arg0: i32, %arg1: memref<16x64xf32, #tpu.memory_space<vmem>>, %arg2: memref<64x32xf32, #tpu.memory_space<vmem>>, %arg3: memref<1x32xf32, #tpu.memory_space<vmem>>, %arg4: memref<16x32xf32, #tpu.memory_space<vmem>>, %arg5: memref<1x32xf32, #tpu.memory_space<vmem>>, %arg6: memref<1x32xf32, #tpu.memory_space<vmem>>, %arg7: memref<16x32xf32, #tpu.memory_space<vmem>>) attributes {dimension_semantics = [#tpu.dimension_semantics<parallel>], iteration_bounds = array<i64: 1>, scalar_prefetch = 0 : i64, scratch_operands = 0 : i64, tpu.core_type = #tpu.core_type<tc>, window_params = [{transform_indices = @transform_0, window_bounds = array<i64: 16, 64>}, {pipeline_mode = #tpu.pipeline_mode<synchronous>, transform_indices = @transform_1, window_bounds = array<i64: 64, 32>}, {pipeline_mode = #tpu.pipeline_mode<synchronous>, transform_indices = @transform_2, window_bounds = array<i64: 1, 32>}, {transform_indices = @transform_3, window_bounds = array<i64: 16, 32>}, {pipeline_mode = #tpu.pipeline_mode<synchronous>, transform_indices = @transform_4, window_bounds = array<i64: 1, 32>}, {pipeline_mode = #tpu.pipeline_mode<synchronous>, transform_indices = @transform_5, window_bounds = array<i64: 1, 32>}, {transform_indices = @transform_6, window_bounds = array<i64: 16, 32>}]} {
    %c0 = arith.constant 0 : index
    %c0_0 = arith.constant 0 : index
    %0 = vector.load %arg1[%c0, %c0_0] : memref<16x64xf32, #tpu.memory_space<vmem>>, vector<16x64xf32>
    %c0_1 = arith.constant 0 : index
    %c0_2 = arith.constant 0 : index
    %1 = vector.load %arg2[%c0_1, %c0_2] : memref<64x32xf32, #tpu.memory_space<vmem>>, vector<64x32xf32>
    %cst = arith.constant dense<0.000000e+00> : vector<16x32xf32>
    %2 = tpu.matmul %0, %1, %cst {dimension_numbers = #tpu.dot_dimension_numbers<[1], [0], [0], [1], [0, 0, 1, 1], [], []>} : vector<16x64xf32>, vector<64x32xf32>, vector<16x32xf32> -> vector<16x32xf32>
    %c0_3 = arith.constant 0 : index
    %c0_4 = arith.constant 0 : index
    %3 = vector.load %arg3[%c0_3, %c0_4] : memref<1x32xf32, #tpu.memory_space<vmem>>, vector<1x32xf32>
    %4 = vector.broadcast %3 : vector<1x32xf32> to vector<16x32xf32>
    %5 = arith.addf %2, %4 : vector<16x32xf32>
    %c0_5 = arith.constant 0 : index
    %c0_6 = arith.constant 0 : index
    %6 = vector.load %arg4[%c0_5, %c0_6] : memref<16x32xf32, #tpu.memory_space<vmem>>, vector<16x32xf32>
    %7 = arith.addf %5, %6 : vector<16x32xf32>
    %cst_7 = arith.constant dense<0.000000e+00> : vector<16xf32>
    %8 = vector.multi_reduction <add>, %7, %cst_7 [1] : vector<16x32xf32> to vector<16xf32>
    %9 = vector.shape_cast %8 : vector<16xf32> to vector<16x1xf32>
    %cst_8 = arith.constant 3.125000e-02 : f32
    %10 = vector.broadcast %cst_8 : f32 to vector<16x1xf32>
    %11 = arith.mulf %9, %10 : vector<16x1xf32>
    %12 = vector.broadcast %11 : vector<16x1xf32> to vector<16x32xf32>
    %13 = arith.subf %7, %12 : vector<16x32xf32>
    %14 = arith.mulf %13, %13 : vector<16x32xf32>
    %cst_9 = arith.constant dense<0.000000e+00> : vector<16xf32>
    %15 = vector.multi_reduction <add>, %14, %cst_9 [1] : vector<16x32xf32> to vector<16xf32>
    %16 = vector.shape_cast %15 : vector<16xf32> to vector<16x1xf32>
    %cst_10 = arith.constant 3.125000e-02 : f32
    %17 = vector.broadcast %cst_10 : f32 to vector<16x1xf32>
    %18 = arith.mulf %16, %17 : vector<16x1xf32>
    %cst_11 = arith.constant 9.99999996E-13 : f32
    %19 = vector.broadcast %cst_11 : f32 to vector<16x1xf32>
    %20 = arith.addf %18, %19 : vector<16x1xf32>
    %21 = math.rsqrt %20 : vector<16x1xf32>
    %22 = vector.broadcast %21 : vector<16x1xf32> to vector<16x32xf32>
    %23 = arith.mulf %13, %22 : vector<16x32xf32>
    %c0_12 = arith.constant 0 : index
    %c0_13 = arith.constant 0 : index
    %24 = vector.load %arg5[%c0_12, %c0_13] : memref<1x32xf32, #tpu.memory_space<vmem>>, vector<1x32xf32>
    %25 = vector.broadcast %24 : vector<1x32xf32> to vector<16x32xf32>
    %26 = arith.mulf %23, %25 : vector<16x32xf32>
    %c0_14 = arith.constant 0 : index
    %c0_15 = arith.constant 0 : index
    %27 = vector.load %arg6[%c0_14, %c0_15] : memref<1x32xf32, #tpu.memory_space<vmem>>, vector<1x32xf32>
    %28 = vector.broadcast %27 : vector<1x32xf32> to vector<16x32xf32>
    %29 = arith.addf %26, %28 : vector<16x32xf32>
    %c0_16 = arith.constant 0 : index
    %c0_17 = arith.constant 0 : index
    %30 = vector.load %arg7[%c0_16, %c0_17] : memref<16x32xf32, #tpu.memory_space<vmem>>, vector<16x32xf32>
    tpu.vector_store %arg7[%c0_16, %c0_17], %29 {strides = array<i32>} : memref<16x32xf32, #tpu.memory_space<vmem>>, vector<16x32xf32>,
    return
  }
  func.func @transform_0(%arg0: i32) -> (i32, i32) {
    %c0_i32 = arith.constant 0 : i32
    %c0_i32_0 = arith.constant 0 : i32
    return %arg0, %c0_i32 : i32, i32
  }
  func.func @transform_1(%arg0: i32) -> (i32, i32) {
    %c0_i32 = arith.constant 0 : i32
    %c0_i32_0 = arith.constant 0 : i32
    %c0_i32_1 = arith.constant 0 : i32
    return %c0_i32, %c0_i32_0 : i32, i32
  }
  func.func @transform_2(%arg0: i32) -> (i32, i32) {
    %c0_i32 = arith.constant 0 : i32
    %c0_i32_0 = arith.constant 0 : i32
    %c0_i32_1 = arith.constant 0 : i32
    return %c0_i32, %c0_i32_0 : i32, i32
  }
  func.func @transform_3(%arg0: i32) -> (i32, i32) {
    %c0_i32 = arith.constant 0 : i32
    %c0_i32_0 = arith.constant 0 : i32
    return %arg0, %c0_i32 : i32, i32
  }
  func.func @transform_4(%arg0: i32) -> (i32, i32) {
    %c0_i32 = arith.constant 0 : i32
    %c0_i32_0 = arith.constant 0 : i32
    %c0_i32_1 = arith.constant 0 : i32
    return %c0_i32, %c0_i32_0 : i32, i32
  }
  func.func @transform_5(%arg0: i32) -> (i32, i32) {
    %c0_i32 = arith.constant 0 : i32
    %c0_i32_0 = arith.constant 0 : i32
    %c0_i32_1 = arith.constant 0 : i32
    return %c0_i32, %c0_i32_0 : i32, i32
  }
  func.func @transform_6(%arg0: i32) -> (i32, i32) {
    %c0_i32 = arith.constant 0 : i32
    %c0_i32_0 = arith.constant 0 : i32
    return %arg0, %c0_i32 : i32, i32
  }
}

</mosaic_0001>

<bundles_post_ra>
// kernel: tpu_custom_call.1
= control target key start
LH: loop header
LB: loop body
LE: loop exit
PB: predicated region body
PF: predicated region fallthrough
CT: control target
= control target key end

     0   :  { %vm41_vm0 = vcmask 523264   ;;  %s374_s0 = inlined_call_operand.vmem [shape: f32[16,64], index: 0, kind: input, shape index: {}]   ;;  %s375_s1 = inlined_call_operand.vmem [shape: f32[64,32], index: 1, kind: input, shape index: {}]   ;;  %s376_s2 = inlined_call_operand.vmem [shape: f32[1,32], index: 2, kind: input, shape index: {}]   ;;  %s377_s3 = inlined_call_operand.vmem [shape: f32[16,32], index: 3, kind: input, shape index: {}]   ;;  %s378_s4 = inlined_call_operand.vmem [shape: f32[1,32], index: 4, kind: input, shape index: {}]   ;;  %s379_s5 = inlined_call_operand.vmem [shape: f32[1,32], index: 5, kind: input, shape index: {}]   ;;  %s380_s6 = inlined_call_operand.hbm [shape: f32[16,32], index: 6, kind: output, shape index: {}]  }
   0x1   :  { %v26_v0 = vld [vmem:[%s375_s1] sm:$0xff]  ;;  %v27_v1 = vld [vmem:[%s375_s1 + $0x8] sm:$0xff]  ;;  %v28_v2 = vld [vmem:[%s375_s1 + $0x10] sm:$0xff] }
   0x2   :  { %v224_v3 = vpack.c.bf16 %v27_v1, %v26_v0  ;;  %v29_v4 = vld [vmem:[%s375_s1 + $0x18] sm:$0xff]  ;;  %v30_v6 = vld [vmem:[%s375_s1 + $0x20] sm:$0xff]  ;;  %v31_v7 = vld [vmem:[%s375_s1 + $0x28] sm:$0xff] }
   0x3   :  { %v228_v5 = vpack.c.bf16 %v29_v4, %v28_v2  ;;  %v24_v8 = vld [vmem:[%s374_s0] sm:$0xff] }
   0x4   :  { %225 = vmatprep.subr.bf16.mxu0 %v224_v3  ;;  %221 = vmatprep.mubr.msk.f32.mxu0 %vm41_vm0, %v24_v8 }
   0x5   :  { %11 = vsyncpa [#allocation3], 0  ;;  %227 = vmatpush3.bf16.msra.mxu0 %v224_v3  ;;  %v232_v9 = vpack.c.bf16 %v31_v7, %v30_v6  ;;  %v32_v10 = vld [vmem:[%s375_s1 + $0x30] sm:$0xff]  ;;  %v33_v11 = vld [vmem:[%s375_s1 + $0x38] sm:$0xff]  ;;  %vm127_vm1 = vcmask 261120   ;;  %s271_s23 = smov [#allocation2]  }
   0x6   :  { %229 = vmatprep.subr.bf16.mxu0 %v228_v5  ;;  %v236_v12 = vpack.c.bf16 %v33_v11, %v32_v10  ;;  %v25_v13 = vld [vmem:[%s374_s0 + $0x8] sm:$0xff]  ;;  %v190_v14 = vld [vmem:[%s376_s2] ss:$0 sm:$0xff]  ;;  %s179_s24 = sshll.u32 %s271_s23, 4  ;;  %s180_s24 = int_to_ptr.vmem [resolvable:$true] %s179_s24 }
   0x7   :  { %v123_v17 = vld [vmem:[%s377_s3] sm:$0xff]  ;;  %v124_v20 = vld [vmem:[%s377_s3 + $0x8] sm:$0xff]  ;;  %s247_s25 = scalar_lea.vmem %s180_s24, 256  ;;  %p252_p1 = scmp.lt.s32.totalorder %s180_s24, %s180_s24 }
   0x8   :  { %v193_v42 = vld [vmem:[%s378_s4] ss:$0 sm:$0xff]  ;;  %p248_p0 = scmp.ne.s32.totalorder %s180_s24, %s247_s25  ;;  %p253_p2 = scmp.lt.s32.totalorder %s247_s25, %s247_s25 }
   0x9   :  { %231 = vmatpush3.bf16.msra.mxu0 %v228_v5  ;;  %v194_v44 = vld [vmem:[%s379_s5] ss:$0 sm:$0xff] }
   0xa   :  { %233 = vmatprep.subr.bf16.mxu0 %v232_v9  ;;  %p254_p3 = por %p253_p2, %p252_p1 }
   0xc   :  { %p255_p4 = pnand %p254_p3, %p248_p0 }
   0xd   :  { %235 = vmatpush3.bf16.msra.mxu0 %v232_v9 }
   0xe   :  { %237 = vmatprep.subr.bf16.mxu0 %v236_v12 }
  0x11   :  { %239 = vmatpush3.bf16.msra.mxu0 %v236_v12 }
  0x14   :  { %222 = vmatmul.mubr.msk.f32.vlgmr.msra.gmra.mrb[0].mxu0 %vm41_vm0, %v25_v13 }
  0xe7   :  { %v223_v15 = vpop.f32.mrb[0].mxu0 }
  0xe8   :  { %v114_v16 = vpop.f32.mrb[1].mxu0  ;;  %v120_v18 = vadd.f32 %v223_v15, %v190_v14 }
  0xe9   :  { %v115_v19 = vadd.f32 %v190_v14, %v114_v16 }
  0xea   :  { %v126_v23 = vadd.f32 %v124_v20, %v120_v18 }
  0xeb   :  { %v125_v21 = vadd.f32 %v123_v17, %v115_v19 }
  0xec   :  { %v131_v24 = vsel %vm127_vm1, %v126_v23, 0.0 }
  0xed   :  { %v128_v22 = vsel %vm127_vm1, %v125_v21, 0.0 }
  0xee   :  { %129 = vadd.xlane.f32.xlu0 %v128_v22 }
  0xf2   :  { %132 = vadd.xlane.f32.xlu0 %v131_v24 }
 0x17b   :  { %v130_v25 = vpop.xlane.xlu0 %129 }
 0x17c   :  { %v134_v26 = vmul.f32 0.03125, %v130_v25 }
 0x17e   :  { %v136_v27 = vsub.f32 %v125_v21, %v134_v26 }
 0x17f   :  { %v133_v28 = vpop.xlane.xlu0 %132 }
 0x180   :  { %v135_v29 = vmul.f32 0.03125, %v133_v28  ;;  %v138_v30 = vmul.f32 %v136_v27, %v136_v27 }
 0x182   :  { %v137_v31 = vsub.f32 %v126_v23, %v135_v29  ;;  %v140_v32 = vsel %vm127_vm1, %v138_v30, 0.0 }
 0x183   :  { %141 = vadd.xlane.f32.xlu1 %v140_v32 }
 0x184   :  { %v139_v33 = vmul.f32 %v137_v31, %v137_v31 }
 0x186   :  { %v143_v34 = vsel %vm127_vm1, %v139_v33, 0.0 }
 0x187   :  { %144 = vadd.xlane.f32.xlu1 %v143_v34 }
 0x210   :  { %v142_v35 = vpop.xlane.xlu1 %141 }
 0x211   :  { %v146_v36 = vmul.f32 0.03125, %v142_v35 }
 0x213   :  { %v148_v37 = vadd.f32 1e-12, %v146_v36 }
 0x214   :  { %v145_v38 = vpop.xlane.xlu1 %144 }
 0x215   :  { %243 = vrsqrt.f32 %v148_v37  ;;  %v147_v39 = vmul.f32 0.03125, %v145_v38 }
 0x217   :  { %v149_v40 = vadd.f32 1e-12, %v147_v39 }
 0x219   :  { %245 = vrsqrt.f32 %v149_v40 }
 0x21f   :  { %v244_v41 = vpop.eup %243 }
 0x220   :  { %v152_v43 = vmul.f32 %v244_v41, %v136_v27 }
 0x222   :  { %v161_v45 = vmul.f32 %v193_v42, %v152_v43 }
 0x223   :  { %v246_v46 = vpop.eup %245 }
 0x224   :  { %v153_v47 = vmul.f32 %v246_v46, %v137_v31  ;;  %v170_v48 = vadd.f32 %v194_v44, %v161_v45 }
 0x226   :  { %v162_v49 = vmul.f32 %v193_v42, %v153_v47  ;;  %172 = vst.msk [vmem:[#allocation2] sm:$0xff] %vm127_vm1, %v170_v48 }
 0x228   :  { %v171_v50 = vadd.f32 %v194_v44, %v162_v49 }
 0x22a   :  { %173 = vst.msk [vmem:[#allocation2 + $0x8] sm:$0xff] %vm127_vm1, %v171_v50 }
 0x22b   :  { %258 = shalt.err (!%p255_p4)
}
 0x22c   :  { %s259_s26 = scalar_lea.hbm %s380_s6, 256 }
 0x22d   :  { %p260_p5 = scmp.ne.s32.totalorder %s380_s6, %s259_s26  ;;  %p263_p6 = scmp.lt.u32.totalorder %s259_s26, %s380_s6 }
 0x22f   :  { %p265_p7 = pnand %p263_p6, %p260_p5 }
 0x231   :  { %268 = shalt.err (!%p265_p7)
}
 0x232   :  { %s272_s7 = smov 128   ;;  %s273_s8 = smov 8  }
 0x233   :  { %185 = dma.vmem_to_hbm [thread:$0]  %s180_s24, 256, %s380_s6, [#allocation3], %s272_s7, %s272_s7, %s273_s8  }
 0x234   :  { %269 = dma.done.wait [#allocation3], 256  }
 0x235   :  { %270 = vsyncadd [#allocation3], 4294967040 }
 0x236   :  { %189 = vsyncpa [#allocation3], 1 }

</bundles_post_ra>
